<compile_context>
chip_gen: v5e
topology: v5e:2x2
jax: 0.10.0
libtpu: 0.0.40
codegen_flags: <defaults>
</compile_context>

<pallas_src>
import functools

import jax
import jax.numpy as jnp
from jax.experimental import pallas as pl
from jax.experimental.pallas import tpu as pltpu


# ----------------------------------------------------------------------------
# Parameter setup (plain JAX glue): contract the ring of cores + central core
# into the effective linear map W.  This mirrors the tensornetwork contraction
# in TWLayer.forward exactly (same edge wiring, same C-order flattening).
# ----------------------------------------------------------------------------
def _chain_contract(cores):
    """Contract a chain of (R, 2, 2, R) cores along their rank bonds.

    Returns T of shape (R, 2**n, 2**n, R) with axes
    (left_bond, flattened physical indices, flattened central indices,
     right_bond), both flattenings in C order (core 0 most significant) to
    match torch's reshape convention.
    """
    T = cores[0]  # (a0, i0, c0, b0)
    for G in cores[1:]:
        T = jnp.tensordot(T, G, axes=([-1], [0]))
    n = len(cores)
    # current axes: (a0, i0, c0, i1, c1, ..., i_{n-1}, c_{n-1}, b)
    perm = [0] + [1 + 2 * k for k in range(n)] + [2 + 2 * k for k in range(n)] + [2 * n + 1]
    T = jnp.transpose(T, perm)
    rank = cores[0].shape[0]
    return T.reshape(rank, 2 ** n, 2 ** n, rank)


def build_tw_weight(input_cores, output_cores, central_core):
    """Build W[2**N, 2**M] equivalent to the tensor-wheel contraction."""
    n_in = len(input_cores)
    n_out = len(output_cores)
    t_in = _chain_contract(input_cores)    # (R, 2^N, 2^N, R)
    t_out = _chain_contract(output_cores)  # (R, 2^M, 2^M, R)
    c_mat = central_core.reshape(2 ** n_in, 2 ** n_out)
    # contract central indices of the input chain with the central core
    a = jnp.einsum('aicb,cd->aidb', t_in, c_mat)
    # ring closure: input_{N-1}.right <-> output_0.left and
    #               output_{M-1}.right <-> input_0.left
    w = jnp.einsum('aidb,bjda->ij', a, t_out)
    return w


# ----------------------------------------------------------------------------
# Pallas kernel: the x-dependent hot path  out = x @ W + bias
# ----------------------------------------------------------------------------
def _tw_matmul_bias_kernel(x_ref, w_ref, b_ref, o_ref):
    w = w_ref[...]                      # bf16 (or f32) weight tile, VMEM-resident
    x = x_ref[...].astype(w.dtype)      # fused cast in-kernel (no extra HBM pass)
    acc = jnp.dot(x, w, preferred_element_type=jnp.float32)   # MXU, f32 accumulate
    o_ref[...] = (acc + b_ref[...]).astype(o_ref.dtype)       # f32 bias add


def _round_up(n, m):
    return ((n + m - 1) // m) * m


@functools.partial(jax.jit, static_argnames=("tile_m", "use_bf16", "out_dtype"))
def tw_forward(x, w, bias, *, tile_m=4096, use_bf16=True, out_dtype=jnp.float32):
    b, d_in = x.shape
    d_out = w.shape[1]

    # Tiny one-time parameter casts (W is <=64 KB here); x is NOT touched in
    # the wrapper -- it goes to the kernel in its native dtype.
    w_op = w.astype(jnp.bfloat16) if use_bf16 else w
    bias_op = bias.astype(jnp.float32)

    # Batch tiling: single grid step for small/medium B, big tiles otherwise.
    # Ragged last tiles are masked by Pallas, so no jnp.pad pass over x.
    if b <= tile_m:
        tm = b
        grid = (1,)
    else:
        tm = _round_up(min(tile_m, b), 8)
        grid = (pl.cdiv(b, tm),)

    out_itemsize = jnp.dtype(out_dtype).itemsize
    # VMEM estimate: double-buffered x/out tiles + (conservatively double
    # buffered) W and bias.  Raise the scoped limit so big tiles don't trip
    # v5e's 16 MiB default; cap below v7x's 64 MiB physical VMEM.
    est_vmem = (2 * tm * d_in * x.dtype.itemsize
                + 2 * tm * d_out * out_itemsize
                + 2 * d_in * d_out * w_op.dtype.itemsize
                + 2 * d_out * 4)
    vmem_limit = int(min(max(32 * 1024 * 1024, 2 * est_vmem), 48 * 1024 * 1024))

    cost = pl.CostEstimate(
        flops=2 * b * d_in * d_out,
        transcendentals=0,
        bytes_accessed=(b * d_in * x.dtype.itemsize          # x in
                        + d_in * d_out * w_op.dtype.itemsize  # W in (once)
                        + d_out * 4                           # bias in
                        + b * d_out * out_itemsize))          # out

    # NOTE: W/bias have constant index_maps so they are DMA'd once and stay
    # VMEM-resident across grid steps.  (pl.Buffered(1) would shave ~32 KB of
    # VMEM but is skipped for portability -- cleanliness only.)
    return pl.pallas_call(
        _tw_matmul_bias_kernel,
        out_shape=jax.ShapeDtypeStruct((b, d_out), out_dtype),
        grid=grid,
        in_specs=[
            pl.BlockSpec((tm, d_in), lambda i: (i, 0)),      # x tile, pipelined
            pl.BlockSpec((d_in, d_out), lambda i: (0, 0)),   # W resident
            pl.BlockSpec((1, d_out), lambda i: (0, 0)),      # bias resident
        ],
        out_specs=pl.BlockSpec((tm, d_out), lambda i: (i, 0)),
        compiler_params=pltpu.CompilerParams(
            dimension_semantics=("parallel",),               # megacore on v7x when grid>=2
            vmem_limit_bytes=vmem_limit),
        cost_estimate=cost,
    )(x, w_op, bias_op)


# ----------------------------------------------------------------------------
# Deterministic parameter construction (matches TWLayer.__init__ shapes:
# normal(mean=0.0, std=0.5)).
# ----------------------------------------------------------------------------
def init_tw_params(key, input_dim, output_dim, rank=10):
    std = 0.5
    keys = jax.random.split(key, input_dim + output_dim + 2)
    input_cores = [std * jax.random.normal(keys[i], (rank, 2, 2, rank), jnp.float32)
                   for i in range(input_dim)]
    output_cores = [std * jax.random.normal(keys[input_dim + i], (rank, 2, 2, rank), jnp.float32)
                    for i in range(output_dim)]
    central_core = std * jax.random.normal(keys[-2], (2,) * (input_dim + output_dim), jnp.float32)
    bias = std * jax.random.normal(keys[-1], (1, 2 ** output_dim), jnp.float32)
    return input_cores, output_cores, central_core, bias


def _rel_err(a, b):
    a = a.astype(jnp.float32)
    b = b.astype(jnp.float32)
    return jnp.linalg.norm(a - b) / (jnp.linalg.norm(b) + 1e-12)


if __name__ == "__main__":
    input_dim = 7    # feature dim = 2**7 = 128 (lane-dense)
    output_dim = 7   # output dim  = 2**7 = 128
    rank = 10
    batch = 512

    key = jax.random.PRNGKey(0)
    pkey, xkey = jax.random.split(key)
    input_cores, output_cores, central_core, bias = init_tw_params(
        pkey, input_dim, output_dim, rank)

    # x has shape (B, 2**input_dim), as the torch module expects before its
    # internal reshape to (B, 2, ..., 2).
    x = jax.random.normal(xkey, (batch, 2 ** input_dim), jnp.float32)

    # Parameter-only contraction (setup) -> effective linear map.
    w = build_tw_weight(input_cores, output_cores, central_core)

    # --- Default path: single grid step (B <= tile_m), no pad, in-kernel cast.
    out = jax.block_until_ready(tw_forward(x, w, bias))
    assert out.shape == (batch, 2 ** output_dim)

    # Reference with identical bf16 operand rounding + f32 accumulation.
    ref_bf = jnp.dot(x.astype(jnp.bfloat16), w.astype(jnp.bfloat16),
                     preferred_element_type=jnp.float32) + bias
    assert _rel_err(out, ref_bf) < 1e-4, "Pallas output mismatch vs bf16 reference"

    # Loose check against the full-precision linear map of the tensor wheel
    # (bf16 operand rounding drift only).
    ref_f32 = x @ w + bias
    assert _rel_err(out, ref_f32) < 5e-2, "bf16 drift vs f32 reference too large"

    # --- Ragged multi-step path: small forced tile => grid=(4,), masked last tile.
    x2 = x[:500]
    out2 = jax.block_until_ready(tw_forward(x2, w, bias, tile_m=128))
    assert out2.shape == (500, 2 ** output_dim)
    ref2 = jnp.dot(x2.astype(jnp.bfloat16), w.astype(jnp.bfloat16),
                   preferred_element_type=jnp.float32) + bias
    assert _rel_err(out2, ref2) < 1e-4, "Pallas ragged-tile output mismatch"

    print("KERNEL_OK")
</pallas_src>

<mosaic_0001>
module attributes {stable_mosaic.version = 11 : i64} {
  func.func @_tw_matmul_bias_kernel(%arg0: i32, %arg1: memref<512x128xf32, #tpu.memory_space<vmem>>, %arg2: memref<128x128xbf16, #tpu.memory_space<vmem>>, %arg3: memref<1x128xf32, #tpu.memory_space<vmem>>, %arg4: memref<512x128xf32, #tpu.memory_space<vmem>>) attributes {dimension_semantics = [#tpu.dimension_semantics<parallel>], iteration_bounds = array<i64: 1>, scalar_prefetch = 0 : i64, scratch_operands = 0 : i64, tpu.core_type = #tpu.core_type<tc>, window_params = [{transform_indices = @transform_0, window_bounds = array<i64: 512, 128>}, {pipeline_mode = #tpu.pipeline_mode<synchronous>, transform_indices = @transform_1, window_bounds = array<i64: 128, 128>}, {pipeline_mode = #tpu.pipeline_mode<synchronous>, transform_indices = @transform_2, window_bounds = array<i64: 1, 128>}, {transform_indices = @transform_3, window_bounds = array<i64: 512, 128>}]} {
    %c0 = arith.constant 0 : index
    %c0_0 = arith.constant 0 : index
    %0 = vector.load %arg2[%c0, %c0_0] : memref<128x128xbf16, #tpu.memory_space<vmem>>, vector<128x128xbf16>
    %c0_1 = arith.constant 0 : index
    %c0_2 = arith.constant 0 : index
    %1 = vector.load %arg1[%c0_1, %c0_2] : memref<512x128xf32, #tpu.memory_space<vmem>>, vector<512x128xf32>
    %2 = arith.truncf %1 : vector<512x128xf32> to vector<512x128xbf16>
    %cst = arith.constant dense<0.000000e+00> : vector<512x128xf32>
    %3 = tpu.matmul %2, %0, %cst {dimension_numbers = #tpu.dot_dimension_numbers<[1], [0], [0], [1], [0, 0, 1, 1], [], []>} : vector<512x128xbf16>, vector<128x128xbf16>, vector<512x128xf32> -> vector<512x128xf32>
    %c0_3 = arith.constant 0 : index
    %c0_4 = arith.constant 0 : index
    %4 = vector.load %arg3[%c0_3, %c0_4] : memref<1x128xf32, #tpu.memory_space<vmem>>, vector<1x128xf32>
    %5 = vector.broadcast %4 : vector<1x128xf32> to vector<512x128xf32>
    %6 = arith.addf %3, %5 : vector<512x128xf32>
    %c0_5 = arith.constant 0 : index
    %c0_6 = arith.constant 0 : index
    %7 = vector.load %arg4[%c0_5, %c0_6] : memref<512x128xf32, #tpu.memory_space<vmem>>, vector<512x128xf32>
    tpu.vector_store %arg4[%c0_5, %c0_6], %6 {strides = array<i32>} : memref<512x128xf32, #tpu.memory_space<vmem>>, vector<512x128xf32>,
    return
  }
  func.func @transform_0(%arg0: i32) -> (i32, i32) {
    %c0_i32 = arith.constant 0 : i32
    %c0_i32_0 = arith.constant 0 : i32
    return %arg0, %c0_i32 : i32, i32
  }
  func.func @transform_1(%arg0: i32) -> (i32, i32) {
    %c0_i32 = arith.constant 0 : i32
    %c0_i32_0 = arith.constant 0 : i32
    %c0_i32_1 = arith.constant 0 : i32
    return %c0_i32, %c0_i32_0 : i32, i32
  }
  func.func @transform_2(%arg0: i32) -> (i32, i32) {
    %c0_i32 = arith.constant 0 : i32
    %c0_i32_0 = arith.constant 0 : i32
    %c0_i32_1 = arith.constant 0 : i32
    return %c0_i32, %c0_i32_0 : i32, i32
  }
  func.func @transform_3(%arg0: i32) -> (i32, i32) {
    %c0_i32 = arith.constant 0 : i32
    %c0_i32_0 = arith.constant 0 : i32
    return %arg0, %c0_i32 : i32, i32
  }
}

</mosaic_0001>

<bundles_post_ra>
// kernel: tw_forward.1
= control target key start
LH: loop header
LB: loop body
LE: loop exit
PB: predicated region body
PF: predicated region fallthrough
CT: control target
= control target key end

     0   :  { %8 = vsyncpa [#allocation3], 0  ;;  %s697_s0 = inlined_call_operand.hbm [shape: f32[512,128], index: 0, kind: input, shape index: {}]   ;;  %s698_s1 = inlined_call_operand.vmem [shape: bf16[128,128], index: 1, kind: input, shape index: {}]   ;;  %s699_s2 = inlined_call_operand.vmem [shape: f32[1,128], index: 2, kind: input, shape index: {}]   ;;  %s700_s3 = inlined_call_operand.hbm [shape: f32[512,128], index: 3, kind: output, shape index: {}]  }
   0x1   :  { %9 = vsyncpa [#allocation4], 0  ;;  %s14_s14 = sshll.u32 %s697_s0, 4  ;;  %s568_s15 = smov [#allocation2]   ;;  %s15_s14 = int_to_ptr.hbm [resolvable:$true] %s14_s14 }
   0x2   :  { %s16_s16 = sshll.u32 %s568_s15, 4  ;;  %s569_s17 = smov 128   ;;  %s17_s16 = int_to_ptr.vmem [resolvable:$true] %s16_s16 }
   0x3   :  { %s570_s18 = smov 8  }
   0x4   :  { %22 = dma.hbm_to_vmem [thread:$0]  %s15_s14, 8192, %s17_s16, [#allocation3], %s569_s17, %s569_s17, %s570_s18  }
   0x5   :  { %564 = dma.done.wait [#allocation3], 8192  }
   0x6   :  { %565 = vsyncadd [#allocation3], 4294959104  ;;  %v486_v0 = vld [vmem:[%s698_s1 + $0x38] sm:$0xff]  ;;  %v485_v1 = vld [vmem:[%s698_s1 + $0x30] sm:$0xff]  ;;  %s434_s11 = sshll.u32 %s700_s3, 4  ;;  %s435_s11 = int_to_ptr.hbm [resolvable:$true] %s434_s11 }
   0x7   :  { %195 = vmatpush.bf16.msra.mxu0 %v486_v0  ;;  %487 = vmatpush.bf16.msra.mxu1 %v486_v0  ;;  %v484_v2 = vld [vmem:[%s698_s1 + $0x28] sm:$0xff]  ;;  %v483_v3 = vld [vmem:[%s698_s1 + $0x20] sm:$0xff]  ;;  %v482_v4 = vld [vmem:[%s698_s1 + $0x18] sm:$0xff] }
   0x8   :  { %488 = vmatpush.bf16.msra.mxu2 %v486_v0  ;;  %489 = vmatpush.bf16.msra.mxu3 %v486_v0  ;;  %v481_v5 = vld [vmem:[%s698_s1 + $0x10] sm:$0xff]  ;;  %v480_v6 = vld [vmem:[%s698_s1 + $0x8] sm:$0xff]  ;;  %v479_v7 = vld [vmem:[%s698_s1] sm:$0xff] }
   0x9   :  { %v47_v8 = vld [vmem:[#allocation2] sm:$0xff]  ;;  %v48_v9 = vld [vmem:[#allocation2 + $0x8] sm:$0xff]  ;;  %v49_v20 = vld [vmem:[#allocation2 + $0x10] sm:$0xff] }
   0xa   :  { %v63_v10 = vld [vmem:[#allocation2 + $0x80] sm:$0xff]  ;;  %v64_v11 = vld [vmem:[#allocation2 + $0x88] sm:$0xff]  ;;  %v111_v16 = vpack.c.bf16 %v48_v9, %v47_v8  ;;  %v50_v21 = vld [vmem:[#allocation2 + $0x18] sm:$0xff] }
   0xb   :  { %196 = vmatpush.bf16.msra.mxu0 %v485_v1  ;;  %490 = vmatpush.bf16.msra.mxu1 %v485_v1  ;;  %v79_v12 = vld [vmem:[#allocation2 + $0x100] sm:$0xff]  ;;  %v80_v13 = vld [vmem:[#allocation2 + $0x108] sm:$0xff]  ;;  %v119_v17 = vpack.c.bf16 %v64_v11, %v63_v10  ;;  %v65_v22 = vld [vmem:[#allocation2 + $0x90] sm:$0xff]  ;;  %v112_v28 = vpack.c.bf16 %v50_v21, %v49_v20 }
   0xc   :  { %491 = vmatpush.bf16.msra.mxu2 %v485_v1  ;;  %492 = vmatpush.bf16.msra.mxu3 %v485_v1  ;;  %v95_v14 = vld [vmem:[#allocation2 + $0x180] sm:$0xff]  ;;  %v96_v15 = vld [vmem:[#allocation2 + $0x188] sm:$0xff]  ;;  %v127_v18 = vpack.c.bf16 %v80_v13, %v79_v12  ;;  %v66_v23 = vld [vmem:[#allocation2 + $0x98] sm:$0xff] }
   0xd   :  { %v135_v19 = vpack.c.bf16 %v96_v15, %v95_v14  ;;  %v81_v24 = vld [vmem:[#allocation2 + $0x110] sm:$0xff]  ;;  %v82_v25 = vld [vmem:[#allocation2 + $0x118] sm:$0xff]  ;;  %v120_v29 = vpack.c.bf16 %v66_v23, %v65_v22  ;;  %v51_v32 = vld [vmem:[#allocation2 + $0x20] sm:$0xff] }
   0xe   :  { %v97_v26 = vld [vmem:[#allocation2 + $0x190] sm:$0xff]  ;;  %v98_v27 = vld [vmem:[#allocation2 + $0x198] sm:$0xff]  ;;  %v128_v30 = vpack.c.bf16 %v82_v25, %v81_v24  ;;  %v52_v33 = vld [vmem:[#allocation2 + $0x28] sm:$0xff] }
   0xf   :  { %197 = vmatpush.bf16.msra.mxu0 %v484_v2  ;;  %493 = vmatpush.bf16.msra.mxu1 %v484_v2  ;;  %v136_v31 = vpack.c.bf16 %v98_v27, %v97_v26  ;;  %v67_v34 = vld [vmem:[#allocation2 + $0xa0] sm:$0xff]  ;;  %v68_v35 = vld [vmem:[#allocation2 + $0xa8] sm:$0xff]  ;;  %v113_v40 = vpack.c.bf16 %v52_v33, %v51_v32  ;;  %v53_v44 = vld [vmem:[#allocation2 + $0x30] sm:$0xff] }
  0x10   :  { %494 = vmatpush.bf16.msra.mxu2 %v484_v2  ;;  %495 = vmatpush.bf16.msra.mxu3 %v484_v2  ;;  %v83_v36 = vld [vmem:[#allocation2 + $0x120] sm:$0xff]  ;;  %v84_v37 = vld [vmem:[#allocation2 + $0x128] sm:$0xff]  ;;  %v121_v41 = vpack.c.bf16 %v68_v35, %v67_v34  ;;  %v54_v45 = vld [vmem:[#allocation2 + $0x38] sm:$0xff] }
  0x11   :  { %v99_v38 = vld [vmem:[#allocation2 + $0x1a0] sm:$0xff]  ;;  %v100_v39 = vld [vmem:[#allocation2 + $0x1a8] sm:$0xff]  ;;  %v129_v42 = vpack.c.bf16 %v84_v37, %v83_v36  ;;  %v69_v46 = vld [vmem:[#allocation2 + $0xb0] sm:$0xff]  ;;  %v114_v52 = vpack.c.bf16 %v54_v45, %v53_v44 }
  0x12   :  { %v137_v43 = vpack.c.bf16 %v100_v39, %v99_v38  ;;  %v70_v47 = vld [vmem:[#allocation2 + $0xb8] sm:$0xff]  ;;  %v85_v48 = vld [vmem:[#allocation2 + $0x130] sm:$0xff]  ;;  %v55_v56 = vld [vmem:[#allocation2 + $0x40] sm:$0xff] }
  0x13   :  { %198 = vmatpush.bf16.msra.mxu0 %v483_v3  ;;  %496 = vmatpush.bf16.msra.mxu1 %v483_v3  ;;  %v86_v49 = vld [vmem:[#allocation2 + $0x138] sm:$0xff]  ;;  %v101_v50 = vld [vmem:[#allocation2 + $0x1b0] sm:$0xff]  ;;  %v122_v53 = vpack.c.bf16 %v70_v47, %v69_v46  ;;  %v56_v57 = vld [vmem:[#allocation2 + $0x48] sm:$0xff] }
  0x14   :  { %497 = vmatpush.bf16.msra.mxu2 %v483_v3  ;;  %498 = vmatpush.bf16.msra.mxu3 %v483_v3  ;;  %v102_v51 = vld [vmem:[#allocation2 + $0x1b8] sm:$0xff]  ;;  %v130_v54 = vpack.c.bf16 %v86_v49, %v85_v48  ;;  %v71_v58 = vld [vmem:[#allocation2 + $0xc0] sm:$0xff]  ;;  %v72_v59 = vld [vmem:[#allocation2 + $0xc8] sm:$0xff]  ;;  %v115_v0 = vpack.c.bf16 %v56_v57, %v55_v56 }
  0x15   :  { %v138_v55 = vpack.c.bf16 %v102_v51, %v101_v50  ;;  %v87_v60 = vld [vmem:[#allocation2 + $0x140] sm:$0xff]  ;;  %v88_v61 = vld [vmem:[#allocation2 + $0x148] sm:$0xff]  ;;  %v123_v1 = vpack.c.bf16 %v72_v59, %v71_v58  ;;  %v89_v8 = vld [vmem:[#allocation2 + $0x150] sm:$0xff] }
  0x16   :  { %v103_v62 = vld [vmem:[#allocation2 + $0x1c0] sm:$0xff]  ;;  %v104_v63 = vld [vmem:[#allocation2 + $0x1c8] sm:$0xff]  ;;  %v131_v2 = vpack.c.bf16 %v88_v61, %v87_v60  ;;  %v90_v9 = vld [vmem:[#allocation2 + $0x158] sm:$0xff] }
  0x17   :  { %199 = vmatpush.bf16.msra.mxu0 %v482_v4  ;;  %499 = vmatpush.bf16.msra.mxu1 %v482_v4  ;;  %v139_v3 = vpack.c.bf16 %v104_v63, %v103_v62  ;;  %v105_v10 = vld [vmem:[#allocation2 + $0x1d0] sm:$0xff]  ;;  %v106_v11 = vld [vmem:[#allocation2 + $0x1d8] sm:$0xff]  ;;  %v132_v14 = vpack.c.bf16 %v90_v9, %v89_v8  ;;  %v91_v20 = vld [vmem:[#allocation2 + $0x160] sm:$0xff] }
  0x18   :  { %500 = vmatpush.bf16.msra.mxu2 %v482_v4  ;;  %501 = vmatpush.bf16.msra.mxu3 %v482_v4  ;;  %v57_v4 = vld [vmem:[#allocation2 + $0x50] sm:$0xff]  ;;  %v140_v15 = vpack.c.bf16 %v106_v11, %v105_v10  ;;  %v92_v21 = vld [vmem:[#allocation2 + $0x168] sm:$0xff]  ;;  %v107_v22 = vld [vmem:[#allocation2 + $0x1e0] sm:$0xff] }
  0x19   :  { %v108_v23 = vld [vmem:[#allocation2 + $0x1e8] sm:$0xff]  ;;  %v133_v26 = vpack.c.bf16 %v92_v21, %v91_v20  ;;  %v93_v32 = vld [vmem:[#allocation2 + $0x170] sm:$0xff]  ;;  %v94_v33 = vld [vmem:[#allocation2 + $0x178] sm:$0xff] }
  0x1a   :  { %v141_v27 = vpack.c.bf16 %v108_v23, %v107_v22  ;;  %v109_v34 = vld [vmem:[#allocation2 + $0x1f0] sm:$0xff]  ;;  %v110_v35 = vld [vmem:[#allocation2 + $0x1f8] sm:$0xff]  ;;  %v134_v38 = vpack.c.bf16 %v94_v33, %v93_v32 }
  0x1b   :  { %200 = vmatpush.bf16.msra.mxu0 %v481_v5  ;;  %502 = vmatpush.bf16.msra.mxu1 %v481_v5  ;;  %v142_v39 = vpack.c.bf16 %v110_v35, %v109_v34 }
  0x1c   :  { %503 = vmatpush.bf16.msra.mxu2 %v481_v5  ;;  %504 = vmatpush.bf16.msra.mxu3 %v481_v5  ;;  %v58_v5 = vld [vmem:[#allocation2 + $0x58] sm:$0xff] }
  0x1d   :  { %v116_v12 = vpack.c.bf16 %v58_v5, %v57_v4 }
  0x1f   :  { %201 = vmatpush.bf16.msra.mxu0 %v480_v6  ;;  %505 = vmatpush.bf16.msra.mxu1 %v480_v6 }
  0x20   :  { %506 = vmatpush.bf16.msra.mxu2 %v480_v6  ;;  %507 = vmatpush.bf16.msra.mxu3 %v480_v6  ;;  %v73_v6 = vld [vmem:[#allocation2 + $0xd0] sm:$0xff] }
  0x23   :  { %202 = vmatpush.bf16.msra.mxu0 %v479_v7  ;;  %508 = vmatpush.bf16.msra.mxu1 %v479_v7 }
  0x24   :  { %509 = vmatpush.bf16.msra.mxu2 %v479_v7  ;;  %510 = vmatpush.bf16.msra.mxu3 %v479_v7  ;;  %v74_v7 = vld [vmem:[#allocation2 + $0xd8] sm:$0xff] }
  0x25   :  { %v124_v13 = vpack.c.bf16 %v74_v7, %v73_v6 }
  0x26   :  { %203 = vmatmul.bf16.vlgmr.msra.gmra.mxu0 %v111_v16  ;;  %243 = vmatmul.bf16.vlgmr.msra.gmra.mxu1 %v119_v17  ;;  %v59_v16 = vld [vmem:[#allocation2 + $0x60] sm:$0xff]  ;;  %v60_v17 = vld [vmem:[#allocation2 + $0x68] sm:$0xff] }
  0x27   :  { %283 = vmatmul.bf16.vlgmr.msra.gmra.mxu2 %v127_v18  ;;  %323 = vmatmul.bf16.vlgmr.msra.gmra.mxu3 %v135_v19  ;;  %v75_v18 = vld [vmem:[#allocation2 + $0xe0] sm:$0xff]  ;;  %v76_v19 = vld [vmem:[#allocation2 + $0xe8] sm:$0xff]  ;;  %v117_v24 = vpack.c.bf16 %v60_v17, %v59_v16 }
  0x28   :  { %v125_v25 = vpack.c.bf16 %v76_v19, %v75_v18 }
  0x36   :  { %208 = vmatmul.bf16.gmra.mxu0 %v112_v28  ;;  %248 = vmatmul.bf16.gmra.mxu1 %v120_v29  ;;  %v61_v28 = vld [vmem:[#allocation2 + $0x70] sm:$0xff]  ;;  %v62_v29 = vld [vmem:[#allocation2 + $0x78] sm:$0xff] }
  0x37   :  { %288 = vmatmul.bf16.gmra.mxu2 %v128_v30  ;;  %328 = vmatmul.bf16.gmra.mxu3 %v136_v31  ;;  %v77_v30 = vld [vmem:[#allocation2 + $0xf0] sm:$0xff]  ;;  %v78_v31 = vld [vmem:[#allocation2 + $0xf8] sm:$0xff]  ;;  %v118_v36 = vpack.c.bf16 %v62_v29, %v61_v28 }
  0x38   :  { %v126_v37 = vpack.c.bf16 %v78_v31, %v77_v30 }
  0x46   :  { %213 = vmatmul.bf16.gmra.mxu0 %v113_v40  ;;  %253 = vmatmul.bf16.gmra.mxu1 %v121_v41  ;;  %v625_v40 = vld [vmem:[%s699_s2] ss:$0 sm:$0xff]  ;;  %s571_s2 = smov [#allocation5]  }
  0x47   :  { %293 = vmatmul.bf16.gmra.mxu2 %v129_v42  ;;  %333 = vmatmul.bf16.gmra.mxu3 %v137_v43  ;;  %s432_s8 = sshll.u32 %s571_s2, 4  ;;  %s433_s8 = int_to_ptr.vmem [resolvable:$true] %s432_s8 }
  0x56   :  { %218 = vmatmul.bf16.gmra.mxu0 %v114_v52  ;;  %258 = vmatmul.bf16.gmra.mxu1 %v122_v53 }
  0x57   :  { %298 = vmatmul.bf16.gmra.mxu2 %v130_v54  ;;  %338 = vmatmul.bf16.gmra.mxu3 %v138_v55 }
  0x66   :  { %223 = vmatmul.bf16.gmra.mxu0 %v115_v0  ;;  %263 = vmatmul.bf16.gmra.mxu1 %v123_v1 }
  0x67   :  { %303 = vmatmul.bf16.gmra.mxu2 %v131_v2  ;;  %343 = vmatmul.bf16.gmra.mxu3 %v139_v3 }
  0x76   :  { %228 = vmatmul.bf16.gmra.mxu0 %v116_v12  ;;  %268 = vmatmul.bf16.gmra.mxu1 %v124_v13 }
  0x77   :  { %308 = vmatmul.bf16.gmra.mxu2 %v132_v14  ;;  %348 = vmatmul.bf16.gmra.mxu3 %v140_v15 }
  0x86   :  { %233 = vmatmul.bf16.gmra.mxu0 %v117_v24  ;;  %273 = vmatmul.bf16.gmra.mxu1 %v125_v25 }
  0x87   :  { %313 = vmatmul.bf16.gmra.mxu2 %v133_v26  ;;  %353 = vmatmul.bf16.gmra.mxu3 %v141_v27 }
  0x96   :  { %238 = vmatmul.bf16.gmra.mxu0 %v118_v36  ;;  %278 = vmatmul.bf16.gmra.mxu1 %v126_v37 }
  0x97   :  { %318 = vmatmul.bf16.gmra.mxu2 %v134_v38  ;;  %358 = vmatmul.bf16.gmra.mxu3 %v142_v39 }
  0xa3   :  { %v204_v41 = vpop.f32.mrf.mxu0  ;;  %v244_v42 = vpop.f32.mrf.mxu1 }
  0xa4   :  { %v205_v43 = vadd.f32 %v625_v40, %v204_v41  ;;  %v245_v44 = vadd.f32 %v625_v40, %v244_v42 }
  0xa6   :  { %364 = vst [vmem:[#allocation5] sm:$0xff] %v205_v43 }
  0xa7   :  { %380 = vst [vmem:[#allocation5 + $0x80] sm:$0xff] %v245_v44 }
  0xaa   :  { %v284_v45 = vpop.f32.mrf.mxu2  ;;  %v324_v46 = vpop.f32.mrf.mxu3 }
  0xab   :  { %v285_v47 = vadd.f32 %v625_v40, %v284_v45  ;;  %v325_v48 = vadd.f32 %v625_v40, %v324_v46  ;;  %v206_v49 = vpop.f32.mrf.mxu0  ;;  %v246_v50 = vpop.f32.mrf.mxu1 }
  0xac   :  { %v207_v51 = vadd.f32 %v625_v40, %v206_v49  ;;  %v247_v52 = vadd.f32 %v625_v40, %v246_v50 }
  0xad   :  { %396 = vst [vmem:[#allocation5 + $0x100] sm:$0xff] %v285_v47 }
  0xae   :  { %412 = vst [vmem:[#allocation5 + $0x180] sm:$0xff] %v325_v48 }
  0xaf   :  { %365 = vst [vmem:[#allocation5 + $0x8] sm:$0xff] %v207_v51 }
  0xb0   :  { %381 = vst [vmem:[#allocation5 + $0x88] sm:$0xff] %v247_v52 }
  0xb2   :  { %v286_v53 = vpop.f32.mrf.mxu2  ;;  %v326_v54 = vpop.f32.mrf.mxu3 }
  0xb3   :  { %v287_v55 = vadd.f32 %v625_v40, %v286_v53  ;;  %v327_v56 = vadd.f32 %v625_v40, %v326_v54  ;;  %v209_v57 = vpop.f32.mrf.mxu0  ;;  %v249_v58 = vpop.f32.mrf.mxu1 }
  0xb4   :  { %v210_v59 = vadd.f32 %v625_v40, %v209_v57  ;;  %v250_v60 = vadd.f32 %v625_v40, %v249_v58 }
  0xb5   :  { %397 = vst [vmem:[#allocation5 + $0x108] sm:$0xff] %v287_v55 }
  0xb6   :  { %413 = vst [vmem:[#allocation5 + $0x188] sm:$0xff] %v327_v56 }
  0xb7   :  { %366 = vst [vmem:[#allocation5 + $0x10] sm:$0xff] %v210_v59 }
  0xb8   :  { %382 = vst [vmem:[#allocation5 + $0x90] sm:$0xff] %v250_v60 }
  0xba   :  { %v289_v61 = vpop.f32.mrf.mxu2  ;;  %v329_v62 = vpop.f32.mrf.mxu3 }
  0xbb   :  { %v290_v63 = vadd.f32 %v625_v40, %v289_v61  ;;  %v330_v0 = vadd.f32 %v625_v40, %v329_v62  ;;  %v211_v1 = vpop.f32.mrf.mxu0  ;;  %v251_v2 = vpop.f32.mrf.mxu1 }
  0xbc   :  { %v212_v3 = vadd.f32 %v625_v40, %v211_v1  ;;  %v252_v4 = vadd.f32 %v625_v40, %v251_v2 }
  0xbd   :  { %398 = vst [vmem:[#allocation5 + $0x110] sm:$0xff] %v290_v63 }
  0xbe   :  { %414 = vst [vmem:[#allocation5 + $0x190] sm:$0xff] %v330_v0 }
  0xbf   :  { %367 = vst [vmem:[#allocation5 + $0x18] sm:$0xff] %v212_v3 }
  0xc0   :  { %383 = vst [vmem:[#allocation5 + $0x98] sm:$0xff] %v252_v4 }
  0xc2   :  { %v291_v5 = vpop.f32.mrf.mxu2  ;;  %v331_v6 = vpop.f32.mrf.mxu3 }
  0xc3   :  { %v292_v7 = vadd.f32 %v625_v40, %v291_v5  ;;  %v332_v8 = vadd.f32 %v625_v40, %v331_v6  ;;  %v214_v9 = vpop.f32.mrf.mxu0  ;;  %v254_v10 = vpop.f32.mrf.mxu1 }
  0xc4   :  { %v215_v11 = vadd.f32 %v625_v40, %v214_v9  ;;  %v255_v12 = vadd.f32 %v625_v40, %v254_v10 }
  0xc5   :  { %399 = vst [vmem:[#allocation5 + $0x118] sm:$0xff] %v292_v7 }
  0xc6   :  { %415 = vst [vmem:[#allocation5 + $0x198] sm:$0xff] %v332_v8 }
  0xc7   :  { %368 = vst [vmem:[#allocation5 + $0x20] sm:$0xff] %v215_v11 }
  0xc8   :  { %384 = vst [vmem:[#allocation5 + $0xa0] sm:$0xff] %v255_v12 }
  0xca   :  { %v294_v13 = vpop.f32.mrf.mxu2  ;;  %v334_v14 = vpop.f32.mrf.mxu3 }
  0xcb   :  { %v295_v15 = vadd.f32 %v625_v40, %v294_v13  ;;  %v335_v16 = vadd.f32 %v625_v40, %v334_v14  ;;  %v216_v17 = vpop.f32.mrf.mxu0  ;;  %v256_v18 = vpop.f32.mrf.mxu1 }
  0xcc   :  { %v217_v19 = vadd.f32 %v625_v40, %v216_v17  ;;  %v257_v20 = vadd.f32 %v625_v40, %v256_v18 }
  0xcd   :  { %400 = vst [vmem:[#allocation5 + $0x120] sm:$0xff] %v295_v15 }
  0xce   :  { %416 = vst [vmem:[#allocation5 + $0x1a0] sm:$0xff] %v335_v16 }
  0xcf   :  { %369 = vst [vmem:[#allocation5 + $0x28] sm:$0xff] %v217_v19 }
  0xd0   :  { %385 = vst [vmem:[#allocation5 + $0xa8] sm:$0xff] %v257_v20 }
  0xd2   :  { %v296_v21 = vpop.f32.mrf.mxu2  ;;  %v336_v22 = vpop.f32.mrf.mxu3 }
  0xd3   :  { %v297_v23 = vadd.f32 %v625_v40, %v296_v21  ;;  %v337_v24 = vadd.f32 %v625_v40, %v336_v22  ;;  %v219_v25 = vpop.f32.mrf.mxu0  ;;  %v259_v26 = vpop.f32.mrf.mxu1 }
  0xd4   :  { %v220_v27 = vadd.f32 %v625_v40, %v219_v25  ;;  %v260_v28 = vadd.f32 %v625_v40, %v259_v26 }
  0xd5   :  { %401 = vst [vmem:[#allocation5 + $0x128] sm:$0xff] %v297_v23 }
  0xd6   :  { %417 = vst [vmem:[#allocation5 + $0x1a8] sm:$0xff] %v337_v24 }
  0xd7   :  { %370 = vst [vmem:[#allocation5 + $0x30] sm:$0xff] %v220_v27 }
  0xd8   :  { %386 = vst [vmem:[#allocation5 + $0xb0] sm:$0xff] %v260_v28 }
  0xda   :  { %v299_v29 = vpop.f32.mrf.mxu2  ;;  %v339_v30 = vpop.f32.mrf.mxu3 }
  0xdb   :  { %v300_v31 = vadd.f32 %v625_v40, %v299_v29  ;;  %v340_v32 = vadd.f32 %v625_v40, %v339_v30  ;;  %v221_v33 = vpop.f32.mrf.mxu0  ;;  %v261_v34 = vpop.f32.mrf.mxu1 }
  0xdc   :  { %v222_v35 = vadd.f32 %v625_v40, %v221_v33  ;;  %v262_v36 = vadd.f32 %v625_v40, %v261_v34 }
  0xdd   :  { %402 = vst [vmem:[#allocation5 + $0x130] sm:$0xff] %v300_v31 }
  0xde   :  { %418 = vst [vmem:[#allocation5 + $0x1b0] sm:$0xff] %v340_v32 }
  0xdf   :  { %371 = vst [vmem:[#allocation5 + $0x38] sm:$0xff] %v222_v35 }
  0xe0   :  { %387 = vst [vmem:[#allocation5 + $0xb8] sm:$0xff] %v262_v36 }
  0xe2   :  { %v301_v37 = vpop.f32.mrf.mxu2  ;;  %v341_v38 = vpop.f32.mrf.mxu3 }
  0xe3   :  { %v302_v39 = vadd.f32 %v625_v40, %v301_v37  ;;  %v342_v41 = vadd.f32 %v625_v40, %v341_v38  ;;  %v224_v42 = vpop.f32.mrf.mxu0  ;;  %v264_v43 = vpop.f32.mrf.mxu1 }
  0xe4   :  { %v225_v44 = vadd.f32 %v625_v40, %v224_v42  ;;  %v265_v45 = vadd.f32 %v625_v40, %v264_v43 }
  0xe5   :  { %403 = vst [vmem:[#allocation5 + $0x138] sm:$0xff] %v302_v39 }
  0xe6   :  { %419 = vst [vmem:[#allocation5 + $0x1b8] sm:$0xff] %v342_v41 }
  0xe7   :  { %372 = vst [vmem:[#allocation5 + $0x40] sm:$0xff] %v225_v44 }
  0xe8   :  { %388 = vst [vmem:[#allocation5 + $0xc0] sm:$0xff] %v265_v45 }
  0xea   :  { %v304_v46 = vpop.f32.mrf.mxu2  ;;  %v344_v47 = vpop.f32.mrf.mxu3 }
  0xeb   :  { %v305_v48 = vadd.f32 %v625_v40, %v304_v46  ;;  %v345_v49 = vadd.f32 %v625_v40, %v344_v47  ;;  %v226_v50 = vpop.f32.mrf.mxu0  ;;  %v266_v51 = vpop.f32.mrf.mxu1 }
  0xec   :  { %v227_v52 = vadd.f32 %v625_v40, %v226_v50  ;;  %v267_v53 = vadd.f32 %v625_v40, %v266_v51 }
  0xed   :  { %404 = vst [vmem:[#allocation5 + $0x140] sm:$0xff] %v305_v48 }
  0xee   :  { %420 = vst [vmem:[#allocation5 + $0x1c0] sm:$0xff] %v345_v49 }
  0xef   :  { %373 = vst [vmem:[#allocation5 + $0x48] sm:$0xff] %v227_v52 }
  0xf0   :  { %389 = vst [vmem:[#allocation5 + $0xc8] sm:$0xff] %v267_v53 }
  0xf2   :  { %v306_v54 = vpop.f32.mrf.mxu2  ;;  %v346_v55 = vpop.f32.mrf.mxu3 }
  0xf3   :  { %v307_v56 = vadd.f32 %v625_v40, %v306_v54  ;;  %v347_v57 = vadd.f32 %v625_v40, %v346_v55  ;;  %v229_v58 = vpop.f32.mrf.mxu0  ;;  %v269_v59 = vpop.f32.mrf.mxu1 }
  0xf4   :  { %v230_v60 = vadd.f32 %v625_v40, %v229_v58  ;;  %v270_v61 = vadd.f32 %v625_v40, %v269_v59 }
  0xf5   :  { %405 = vst [vmem:[#allocation5 + $0x148] sm:$0xff] %v307_v56 }
  0xf6   :  { %421 = vst [vmem:[#allocation5 + $0x1c8] sm:$0xff] %v347_v57 }
  0xf7   :  { %374 = vst [vmem:[#allocation5 + $0x50] sm:$0xff] %v230_v60 }
  0xf8   :  { %390 = vst [vmem:[#allocation5 + $0xd0] sm:$0xff] %v270_v61 }
  0xfa   :  { %v309_v62 = vpop.f32.mrf.mxu2  ;;  %v349_v63 = vpop.f32.mrf.mxu3 }
  0xfb   :  { %v310_v0 = vadd.f32 %v625_v40, %v309_v62  ;;  %v350_v1 = vadd.f32 %v625_v40, %v349_v63  ;;  %v231_v2 = vpop.f32.mrf.mxu0  ;;  %v271_v3 = vpop.f32.mrf.mxu1 }
  0xfc   :  { %v232_v4 = vadd.f32 %v625_v40, %v231_v2  ;;  %v272_v5 = vadd.f32 %v625_v40, %v271_v3 }
  0xfd   :  { %406 = vst [vmem:[#allocation5 + $0x150] sm:$0xff] %v310_v0 }
  0xfe   :  { %422 = vst [vmem:[#allocation5 + $0x1d0] sm:$0xff] %v350_v1 }
  0xff   :  { %375 = vst [vmem:[#allocation5 + $0x58] sm:$0xff] %v232_v4 }
 0x100   :  { %391 = vst [vmem:[#allocation5 + $0xd8] sm:$0xff] %v272_v5 }
 0x102   :  { %v311_v6 = vpop.f32.mrf.mxu2  ;;  %v351_v7 = vpop.f32.mrf.mxu3 }
 0x103   :  { %v312_v8 = vadd.f32 %v625_v40, %v311_v6  ;;  %v352_v9 = vadd.f32 %v625_v40, %v351_v7  ;;  %v234_v10 = vpop.f32.mrf.mxu0  ;;  %v274_v11 = vpop.f32.mrf.mxu1 }
 0x104   :  { %v235_v12 = vadd.f32 %v625_v40, %v234_v10  ;;  %v275_v13 = vadd.f32 %v625_v40, %v274_v11 }
 0x105   :  { %407 = vst [vmem:[#allocation5 + $0x158] sm:$0xff] %v312_v8 }
 0x106   :  { %423 = vst [vmem:[#allocation5 + $0x1d8] sm:$0xff] %v352_v9 }
 0x107   :  { %376 = vst [vmem:[#allocation5 + $0x60] sm:$0xff] %v235_v12 }
 0x108   :  { %392 = vst [vmem:[#allocation5 + $0xe0] sm:$0xff] %v275_v13 }
 0x10a   :  { %v314_v14 = vpop.f32.mrf.mxu2  ;;  %v354_v15 = vpop.f32.mrf.mxu3 }
 0x10b   :  { %v315_v16 = vadd.f32 %v625_v40, %v314_v14  ;;  %v355_v17 = vadd.f32 %v625_v40, %v354_v15  ;;  %v236_v18 = vpop.f32.mrf.mxu0  ;;  %v276_v19 = vpop.f32.mrf.mxu1 }
 0x10c   :  { %v237_v20 = vadd.f32 %v625_v40, %v236_v18  ;;  %v277_v21 = vadd.f32 %v625_v40, %v276_v19 }
 0x10d   :  { %408 = vst [vmem:[#allocation5 + $0x160] sm:$0xff] %v315_v16 }
 0x10e   :  { %424 = vst [vmem:[#allocation5 + $0x1e0] sm:$0xff] %v355_v17 }
 0x10f   :  { %377 = vst [vmem:[#allocation5 + $0x68] sm:$0xff] %v237_v20 }
 0x110   :  { %393 = vst [vmem:[#allocation5 + $0xe8] sm:$0xff] %v277_v21 }
 0x112   :  { %v316_v22 = vpop.f32.mrf.mxu2  ;;  %v356_v23 = vpop.f32.mrf.mxu3 }
 0x113   :  { %v317_v24 = vadd.f32 %v625_v40, %v316_v22  ;;  %v357_v25 = vadd.f32 %v625_v40, %v356_v23  ;;  %v239_v26 = vpop.f32.mrf.mxu0  ;;  %v279_v27 = vpop.f32.mrf.mxu1 }
 0x114   :  { %v240_v28 = vadd.f32 %v625_v40, %v239_v26  ;;  %v280_v29 = vadd.f32 %v625_v40, %v279_v27 }
 0x115   :  { %409 = vst [vmem:[#allocation5 + $0x168] sm:$0xff] %v317_v24 }
 0x116   :  { %425 = vst [vmem:[#allocation5 + $0x1e8] sm:$0xff] %v357_v25 }
 0x117   :  { %378 = vst [vmem:[#allocation5 + $0x70] sm:$0xff] %v240_v28 }
 0x118   :  { %394 = vst [vmem:[#allocation5 + $0xf0] sm:$0xff] %v280_v29 }
 0x11a   :  { %v319_v30 = vpop.f32.mrf.mxu2  ;;  %v359_v31 = vpop.f32.mrf.mxu3 }
 0x11b   :  { %v320_v32 = vadd.f32 %v625_v40, %v319_v30  ;;  %v360_v33 = vadd.f32 %v625_v40, %v359_v31  ;;  %v241_v34 = vpop.f32.mrf.mxu0  ;;  %v281_v35 = vpop.f32.mrf.mxu1 }
 0x11c   :  { %v242_v36 = vadd.f32 %v625_v40, %v241_v34  ;;  %v282_v37 = vadd.f32 %v625_v40, %v281_v35 }
 0x11d   :  { %410 = vst [vmem:[#allocation5 + $0x170] sm:$0xff] %v320_v32 }
 0x11e   :  { %426 = vst [vmem:[#allocation5 + $0x1f0] sm:$0xff] %v360_v33 }
 0x11f   :  { %379 = vst [vmem:[#allocation5 + $0x78] sm:$0xff] %v242_v36 }
 0x120   :  { %395 = vst [vmem:[#allocation5 + $0xf8] sm:$0xff] %v282_v37 }
 0x122   :  { %v321_v38 = vpop.f32.mrf.mxu2  ;;  %v361_v39 = vpop.f32.mrf.mxu3 }
 0x123   :  { %v322_v41 = vadd.f32 %v625_v40, %v321_v38  ;;  %v362_v42 = vadd.f32 %v625_v40, %v361_v39 }
 0x125   :  { %411 = vst [vmem:[#allocation5 + $0x178] sm:$0xff] %v322_v41 }
 0x126   :  { %427 = vst [vmem:[#allocation5 + $0x1f8] sm:$0xff] %v362_v42 }
 0x127   :  { %440 = dma.vmem_to_hbm [thread:$0]  %s433_s8, 8192, %s435_s11, [#allocation4], %s569_s17, %s569_s17, %s570_s18  }
 0x128   :  { %566 = dma.done.wait [#allocation4], 8192  }
 0x129   :  { %567 = vsyncadd [#allocation4], 4294959104 }
 0x12a   :  { %445 = vsyncpa [#allocation3], 1 }
 0x12b   :  { %446 = vsyncpa [#allocation4], 1 }

</bundles_post_ra>
